<compile_context>
chip_gen: v5e
topology: v5e:2x2
jax: 0.10.0
libtpu: 0.0.40
codegen_flags: <defaults>
</compile_context>

<pallas_src>
import functools

import jax
import jax.numpy as jnp
import numpy as np
from jax import lax
from jax.experimental import pallas as pl
from jax.experimental.pallas import tpu as pltpu

LN_EPS = 1e-5  # nn.LayerNorm default


def _layernorm(x, g, b):
    mu = jnp.mean(x, axis=-1, keepdims=True)
    var = jnp.mean((x - mu) ** 2, axis=-1, keepdims=True)
    return (x - mu) * lax.rsqrt(var + LN_EPS) * g + b


def _gelu_exact(x):
    # nn.GELU default is the exact (erf) formulation.
    return 0.5 * x * (1.0 + lax.erf(x * (1.0 / np.sqrt(2.0))))


def block_kernel(
    x_ref,
    ln1_g_ref, ln1_b_ref,
    wqkv_ref,
    wproj_ref, bproj_ref,
    ln2_g_ref, ln2_b_ref,
    w1_ref, b1_ref,
    w2_ref, b2_ref,
    o_ref,
    *, num_heads,
):
    x = x_ref[0]                      # (N, C) fp32
    N, C = x.shape
    hd = C // num_heads
    scale = hd ** (-0.5)

    # ---------- attention branch ----------
    xn = _layernorm(x, ln1_g_ref[...], ln1_b_ref[...])            # fp32 (VPU)
    qkv = jnp.dot(xn.astype(jnp.bfloat16), wqkv_ref[...],         # bf16 x bf16 -> fp32 acc
                  preferred_element_type=jnp.float32)             # (N, 3C)
    q = qkv[:, 0:C]
    k = qkv[:, C:2 * C]
    v = qkv[:, 2 * C:3 * C]

    wproj = wproj_ref[...]                                        # (C, C) bf16, read once
    attn_acc = jnp.zeros((N, C), jnp.float32)
    for h in range(num_heads):                                    # static loop, few heads
        hs, he = h * hd, (h + 1) * hd
        qh = (q[:, hs:he] * scale).astype(jnp.bfloat16)
        kh = k[:, hs:he].astype(jnp.bfloat16)
        vh = v[:, hs:he].astype(jnp.bfloat16)
        # Contract last dims of q and k: no explicit K transpose.
        s = lax.dot_general(qh, kh, (((1,), (1,)), ((), ())),
                            preferred_element_type=jnp.float32)   # (N, N) fp32
        s = s - jnp.max(s, axis=-1, keepdims=True)
        p = jnp.exp(s)                                            # fp32 softmax
        p = p * pl.reciprocal(jnp.sum(p, axis=-1, keepdims=True), approx=True)
        ho = jnp.dot(p.astype(jnp.bfloat16), vh,
                     preferred_element_type=jnp.float32)          # (N, hd)
        # Fold the output projection into the head loop (no lane-dim concat).
        attn_acc = attn_acc + jnp.dot(ho.astype(jnp.bfloat16), wproj[hs:he, :],
                                      preferred_element_type=jnp.float32)
    x = x + attn_acc + bproj_ref[...]

    # ---------- MLP branch ----------
    xn2 = _layernorm(x, ln2_g_ref[...], ln2_b_ref[...])
    h1 = jnp.dot(xn2.astype(jnp.bfloat16), w1_ref[...],
                 preferred_element_type=jnp.float32) + b1_ref[...]
    h1 = _gelu_exact(h1)                                          # exact erf GELU, fp32
    h2 = jnp.dot(h1.astype(jnp.bfloat16), w2_ref[...],
                 preferred_element_type=jnp.float32) + b2_ref[...]
    o_ref[0] = x + h2


def vit_block(x, params, num_heads):
    B, N, C = x.shape
    H = params["w1"].shape[1]

    def full_spec(shape):
        # full-extent block for parameters, independent of grid index
        return pl.BlockSpec(shape, lambda b, _n=len(shape): (0,) * _n)

    in_specs = [
        pl.BlockSpec((1, N, C), lambda b: (b, 0, 0)),   # x  (fp32)
        full_spec((1, C)),                              # ln1_g (fp32)
        full_spec((1, C)),                              # ln1_b (fp32)
        full_spec((C, 3 * C)),                          # wqkv  (bf16, transposed)
        full_spec((C, C)),                              # wproj (bf16, transposed)
        full_spec((1, C)),                              # bproj (fp32)
        full_spec((1, C)),                              # ln2_g (fp32)
        full_spec((1, C)),                              # ln2_b (fp32)
        full_spec((C, H)),                              # w1    (bf16, transposed)
        full_spec((1, H)),                              # b1    (fp32)
        full_spec((H, C)),                              # w2    (bf16, transposed)
        full_spec((1, C)),                              # b2    (fp32)
    ]

    kernel = functools.partial(block_kernel, num_heads=num_heads)
    return pl.pallas_call(
        kernel,
        out_shape=jax.ShapeDtypeStruct((B, N, C), jnp.float32),
        grid_spec=pltpu.PrefetchScalarGridSpec(
            num_scalar_prefetch=0,
            grid=(B,),
            in_specs=in_specs,
            out_specs=pl.BlockSpec((1, N, C), lambda b: (b, 0, 0)),
        ),
        compiler_params=pltpu.CompilerParams(
            dimension_semantics=("parallel",),
            vmem_limit_bytes=64 * 1024 * 1024,
        ),
    )(
        x,
        params["ln1_g"], params["ln1_b"],
        params["wqkv"],
        params["wproj"], params["bproj"],
        params["ln2_g"], params["ln2_b"],
        params["w1"], params["b1"],
        params["w2"], params["b2"],
    )


def vit_block_reference(x, p, num_heads):
    """Pure-JAX reference mirroring the PyTorch Block forward (fp32 math,
    bf16 weights upcast — same quantized weights as the kernel)."""
    B, N, C = x.shape
    hd = C // num_heads

    def ln(t, g, b):
        mu = t.mean(-1, keepdims=True)
        var = ((t - mu) ** 2).mean(-1, keepdims=True)
        return (t - mu) / jnp.sqrt(var + LN_EPS) * g + b

    def mm(a, w):
        return jnp.matmul(a, w.astype(jnp.float32))

    xn = ln(x, p["ln1_g"][0], p["ln1_b"][0])
    qkv = mm(xn, p["wqkv"])
    qkv = qkv.reshape(B, N, 3, num_heads, hd).transpose(2, 0, 3, 1, 4)
    q, k, v = qkv[0], qkv[1], qkv[2]
    attn = (q * hd ** -0.5) @ jnp.swapaxes(k, -2, -1)
    attn = jax.nn.softmax(attn, axis=-1)
    o = (attn @ v).transpose(0, 2, 1, 3).reshape(B, N, C)
    o = mm(o, p["wproj"]) + p["bproj"][0]
    x = x + o
    xn2 = ln(x, p["ln2_g"][0], p["ln2_b"][0])
    h = jax.nn.gelu(mm(xn2, p["w1"]) + p["b1"][0], approximate=False)
    h = mm(h, p["w2"]) + p["b2"][0]
    return x + h


def init_params(key, dim, num_heads, mlp_ratio=4.0):
    H = int(dim * mlp_ratio)
    ks = jax.random.split(key, 8)
    s = 0.05
    return {
        "ln1_g": jnp.ones((1, dim), jnp.float32),
        "ln1_b": jnp.zeros((1, dim), jnp.float32),
        # qkv_bias=False (Block default) -> no qkv bias
        # Linear weights pre-transposed to (in, out) and stored in bf16.
        "wqkv": (s * jax.random.normal(ks[0], (dim, 3 * dim), jnp.float32)).astype(jnp.bfloat16),
        "wproj": (s * jax.random.normal(ks[1], (dim, dim), jnp.float32)).astype(jnp.bfloat16),
        "bproj": s * jax.random.normal(ks[2], (1, dim), jnp.float32),
        "ln2_g": jnp.ones((1, dim), jnp.float32),
        "ln2_b": jnp.zeros((1, dim), jnp.float32),
        "w1": (s * jax.random.normal(ks[3], (dim, H), jnp.float32)).astype(jnp.bfloat16),
        "b1": s * jax.random.normal(ks[4], (1, H), jnp.float32),
        "w2": (s * jax.random.normal(ks[5], (H, dim), jnp.float32)).astype(jnp.bfloat16),
        "b2": s * jax.random.normal(ks[6], (1, dim), jnp.float32),
    }


if __name__ == "__main__":
    B, N, C = 2, 8, 32
    num_heads = 4

    key = jax.random.PRNGKey(0)
    kx, kp = jax.random.split(key)
    x = jax.random.normal(kx, (B, N, C), jnp.float32)
    params = init_params(kp, C, num_heads)

    out = vit_block(x, params, num_heads)
    out = jax.block_until_ready(out)

    ref = vit_block_reference(x, params, num_heads)
    # bf16 matmul operands + approx reciprocal loosen the tolerance slightly.
    np.testing.assert_allclose(np.asarray(out), np.asarray(ref), rtol=2e-2, atol=2e-2)

    print("KERNEL_OK")
</pallas_src>

<mosaic_0001>
module attributes {stable_mosaic.version = 11 : i64} {
  func.func @block_kernel(%arg0: i32, %arg1: memref<1x8x32xf32, #tpu.memory_space<vmem>>, %arg2: memref<1x32xf32, #tpu.memory_space<vmem>>, %arg3: memref<1x32xf32, #tpu.memory_space<vmem>>, %arg4: memref<32x96xbf16, #tpu.memory_space<vmem>>, %arg5: memref<32x32xbf16, #tpu.memory_space<vmem>>, %arg6: memref<1x32xf32, #tpu.memory_space<vmem>>, %arg7: memref<1x32xf32, #tpu.memory_space<vmem>>, %arg8: memref<1x32xf32, #tpu.memory_space<vmem>>, %arg9: memref<32x128xbf16, #tpu.memory_space<vmem>>, %arg10: memref<1x128xf32, #tpu.memory_space<vmem>>, %arg11: memref<128x32xbf16, #tpu.memory_space<vmem>>, %arg12: memref<1x32xf32, #tpu.memory_space<vmem>>, %arg13: memref<1x8x32xf32, #tpu.memory_space<vmem>>) attributes {dimension_semantics = [#tpu.dimension_semantics<parallel>], iteration_bounds = array<i64: 2>, scalar_prefetch = 0 : i64, scratch_operands = 0 : i64, tpu.core_type = #tpu.core_type<tc>, window_params = [{transform_indices = @transform_0, window_bounds = array<i64: 1, 8, 32>}, {pipeline_mode = #tpu.pipeline_mode<synchronous>, transform_indices = @transform_1, window_bounds = array<i64: 1, 32>}, {pipeline_mode = #tpu.pipeline_mode<synchronous>, transform_indices = @transform_2, window_bounds = array<i64: 1, 32>}, {pipeline_mode = #tpu.pipeline_mode<synchronous>, transform_indices = @transform_3, window_bounds = array<i64: 32, 96>}, {pipeline_mode = #tpu.pipeline_mode<synchronous>, transform_indices = @transform_4, window_bounds = array<i64: 32, 32>}, {pipeline_mode = #tpu.pipeline_mode<synchronous>, transform_indices = @transform_5, window_bounds = array<i64: 1, 32>}, {pipeline_mode = #tpu.pipeline_mode<synchronous>, transform_indices = @transform_6, window_bounds = array<i64: 1, 32>}, {pipeline_mode = #tpu.pipeline_mode<synchronous>, transform_indices = @transform_7, window_bounds = array<i64: 1, 32>}, {pipeline_mode = #tpu.pipeline_mode<synchronous>, transform_indices = @transform_8, window_bounds = array<i64: 32, 128>}, {pipeline_mode = #tpu.pipeline_mode<synchronous>, transform_indices = @transform_9, window_bounds = array<i64: 1, 128>}, {pipeline_mode = #tpu.pipeline_mode<synchronous>, transform_indices = @transform_10, window_bounds = array<i64: 128, 32>}, {pipeline_mode = #tpu.pipeline_mode<synchronous>, transform_indices = @transform_11, window_bounds = array<i64: 1, 32>}, {transform_indices = @transform_12, window_bounds = array<i64: 1, 8, 32>}]} {
    %c0 = arith.constant 0 : index
    %c0_0 = arith.constant 0 : index
    %c0_1 = arith.constant 0 : index
    %0 = vector.load %arg1[%c0, %c0_0, %c0_1] : memref<1x8x32xf32, #tpu.memory_space<vmem>>, vector<1x8x32xf32>
    %1 = vector.shape_cast %0 : vector<1x8x32xf32> to vector<8x32xf32>
    %c0_2 = arith.constant 0 : index
    %c0_3 = arith.constant 0 : index
    %2 = vector.load %arg2[%c0_2, %c0_3] : memref<1x32xf32, #tpu.memory_space<vmem>>, vector<1x32xf32>
    %c0_4 = arith.constant 0 : index
    %c0_5 = arith.constant 0 : index
    %3 = vector.load %arg3[%c0_4, %c0_5] : memref<1x32xf32, #tpu.memory_space<vmem>>, vector<1x32xf32>
    %cst = arith.constant dense<0.000000e+00> : vector<8xf32>
    %4 = vector.multi_reduction <add>, %1, %cst [1] : vector<8x32xf32> to vector<8xf32>
    %5 = vector.shape_cast %4 : vector<8xf32> to vector<8x1xf32>
    %cst_6 = arith.constant 3.200000e+01 : f32
    %6 = vector.broadcast %cst_6 : f32 to vector<8x1xf32>
    %7 = arith.divf %5, %6 : vector<8x1xf32>
    %8 = vector.broadcast %7 : vector<8x1xf32> to vector<8x32xf32>
    %9 = arith.subf %1, %8 : vector<8x32xf32>
    %10 = arith.mulf %9, %9 : vector<8x32xf32>
    %cst_7 = arith.constant dense<0.000000e+00> : vector<8xf32>
    %11 = vector.multi_reduction <add>, %10, %cst_7 [1] : vector<8x32xf32> to vector<8xf32>
    %12 = vector.shape_cast %11 : vector<8xf32> to vector<8x1xf32>
    %cst_8 = arith.constant 3.200000e+01 : f32
    %13 = vector.broadcast %cst_8 : f32 to vector<8x1xf32>
    %14 = arith.divf %12, %13 : vector<8x1xf32>
    %15 = vector.broadcast %7 : vector<8x1xf32> to vector<8x32xf32>
    %16 = arith.subf %1, %15 : vector<8x32xf32>
    %cst_9 = arith.constant 9.99999974E-6 : f32
    %17 = vector.broadcast %cst_9 : f32 to vector<8x1xf32>
    %18 = arith.addf %14, %17 : vector<8x1xf32>
    %19 = math.rsqrt %18 : vector<8x1xf32>
    %20 = vector.broadcast %19 : vector<8x1xf32> to vector<8x32xf32>
    %21 = arith.mulf %16, %20 : vector<8x32xf32>
    %22 = vector.broadcast %2 : vector<1x32xf32> to vector<8x32xf32>
    %23 = arith.mulf %21, %22 : vector<8x32xf32>
    %24 = vector.broadcast %3 : vector<1x32xf32> to vector<8x32xf32>
    %25 = arith.addf %23, %24 : vector<8x32xf32>
    %26 = arith.truncf %25 : vector<8x32xf32> to vector<8x32xbf16>
    %c0_10 = arith.constant 0 : index
    %c0_11 = arith.constant 0 : index
    %27 = vector.load %arg4[%c0_10, %c0_11] : memref<32x96xbf16, #tpu.memory_space<vmem>>, vector<32x96xbf16>
    %cst_12 = arith.constant dense<0.000000e+00> : vector<8x96xf32>
    %28 = tpu.matmul %26, %27, %cst_12 {dimension_numbers = #tpu.dot_dimension_numbers<[1], [0], [0], [1], [0, 0, 1, 1], [], []>} : vector<8x32xbf16>, vector<32x96xbf16>, vector<8x96xf32> -> vector<8x96xf32>
    %29 = vector.extract_strided_slice %28 {offsets = [0, 0], sizes = [8, 32], strides = [1, 1]} : vector<8x96xf32> to vector<8x32xf32>
    %30 = vector.extract_strided_slice %28 {offsets = [0, 32], sizes = [8, 32], strides = [1, 1]} : vector<8x96xf32> to vector<8x32xf32>
    %31 = vector.extract_strided_slice %28 {offsets = [0, 64], sizes = [8, 32], strides = [1, 1]} : vector<8x96xf32> to vector<8x32xf32>
    %c0_13 = arith.constant 0 : index
    %c0_14 = arith.constant 0 : index
    %32 = vector.load %arg5[%c0_13, %c0_14] : memref<32x32xbf16, #tpu.memory_space<vmem>>, vector<32x32xbf16>
    %cst_15 = arith.constant 0.000000e+00 : f32
    %33 = vector.broadcast %cst_15 : f32 to vector<8x32xf32>
    %34 = vector.extract_strided_slice %29 {offsets = [0, 0], sizes = [8, 8], strides = [1, 1]} : vector<8x32xf32> to vector<8x8xf32>
    %cst_16 = arith.constant 0.353553385 : f32
    %35 = vector.broadcast %cst_16 : f32 to vector<8x8xf32>
    %36 = arith.mulf %34, %35 : vector<8x8xf32>
    %37 = arith.truncf %36 : vector<8x8xf32> to vector<8x8xbf16>
    %38 = vector.extract_strided_slice %30 {offsets = [0, 0], sizes = [8, 8], strides = [1, 1]} : vector<8x32xf32> to vector<8x8xf32>
    %39 = arith.truncf %38 : vector<8x8xf32> to vector<8x8xbf16>
    %40 = vector.extract_strided_slice %31 {offsets = [0, 0], sizes = [8, 8], strides = [1, 1]} : vector<8x32xf32> to vector<8x8xf32>
    %41 = arith.truncf %40 : vector<8x8xf32> to vector<8x8xbf16>
    %cst_17 = arith.constant dense<0.000000e+00> : vector<8x8xf32>
    %42 = tpu.matmul %37, %39, %cst_17 {dimension_numbers = #tpu.dot_dimension_numbers<[1], [1], [0], [0], [0, 0, 1, 0], [], []>} : vector<8x8xbf16>, vector<8x8xbf16>, vector<8x8xf32> -> vector<8x8xf32>
    %cst_18 = arith.constant dense<0xFF800000> : vector<8xf32>
    %43 = vector.multi_reduction <maximumf>, %42, %cst_18 [1] : vector<8x8xf32> to vector<8xf32>
    %44 = vector.shape_cast %43 : vector<8xf32> to vector<8x1xf32>
    %45 = vector.broadcast %44 : vector<8x1xf32> to vector<8x8xf32>
    %46 = arith.subf %42, %45 : vector<8x8xf32>
    %47 = math.exp %46 : vector<8x8xf32>
    %cst_19 = arith.constant dense<0.000000e+00> : vector<8xf32>
    %48 = vector.multi_reduction <add>, %47, %cst_19 [1] : vector<8x8xf32> to vector<8xf32>
    %49 = vector.shape_cast %48 : vector<8xf32> to vector<8x1xf32>
    %50 = tpu.reciprocal %49 {approx = true} : vector<8x1xf32> -> vector<8x1xf32>
    %51 = vector.broadcast %50 : vector<8x1xf32> to vector<8x8xf32>
    %52 = arith.mulf %47, %51 : vector<8x8xf32>
    %53 = arith.truncf %52 : vector<8x8xf32> to vector<8x8xbf16>
    %cst_20 = arith.constant dense<0.000000e+00> : vector<8x8xf32>
    %54 = tpu.matmul %53, %41, %cst_20 {dimension_numbers = #tpu.dot_dimension_numbers<[1], [0], [0], [1], [0, 0, 1, 1], [], []>} : vector<8x8xbf16>, vector<8x8xbf16>, vector<8x8xf32> -> vector<8x8xf32>
    %55 = arith.truncf %54 : vector<8x8xf32> to vector<8x8xbf16>
    %56 = vector.extract_strided_slice %32 {offsets = [0, 0], sizes = [8, 32], strides = [1, 1]} : vector<32x32xbf16> to vector<8x32xbf16>
    %cst_21 = arith.constant dense<0.000000e+00> : vector<8x32xf32>
    %57 = tpu.matmul %55, %56, %cst_21 {dimension_numbers = #tpu.dot_dimension_numbers<[1], [0], [0], [1], [0, 0, 1, 1], [], []>} : vector<8x8xbf16>, vector<8x32xbf16>, vector<8x32xf32> -> vector<8x32xf32>
    %58 = arith.addf %33, %57 : vector<8x32xf32>
    %59 = vector.extract_strided_slice %29 {offsets = [0, 8], sizes = [8, 8], strides = [1, 1]} : vector<8x32xf32> to vector<8x8xf32>
    %cst_22 = arith.constant 0.353553385 : f32
    %60 = vector.broadcast %cst_22 : f32 to vector<8x8xf32>
    %61 = arith.mulf %59, %60 : vector<8x8xf32>
    %62 = arith.truncf %61 : vector<8x8xf32> to vector<8x8xbf16>
    %63 = vector.extract_strided_slice %30 {offsets = [0, 8], sizes = [8, 8], strides = [1, 1]} : vector<8x32xf32> to vector<8x8xf32>
    %64 = arith.truncf %63 : vector<8x8xf32> to vector<8x8xbf16>
    %65 = vector.extract_strided_slice %31 {offsets = [0, 8], sizes = [8, 8], strides = [1, 1]} : vector<8x32xf32> to vector<8x8xf32>
    %66 = arith.truncf %65 : vector<8x8xf32> to vector<8x8xbf16>
    %cst_23 = arith.constant dense<0.000000e+00> : vector<8x8xf32>
    %67 = tpu.matmul %62, %64, %cst_23 {dimension_numbers = #tpu.dot_dimension_numbers<[1], [1], [0], [0], [0, 0, 1, 0], [], []>} : vector<8x8xbf16>, vector<8x8xbf16>, vector<8x8xf32> -> vector<8x8xf32>
    %cst_24 = arith.constant dense<0xFF800000> : vector<8xf32>
    %68 = vector.multi_reduction <maximumf>, %67, %cst_24 [1] : vector<8x8xf32> to vector<8xf32>
    %69 = vector.shape_cast %68 : vector<8xf32> to vector<8x1xf32>
    %70 = vector.broadcast %69 : vector<8x1xf32> to vector<8x8xf32>
    %71 = arith.subf %67, %70 : vector<8x8xf32>
    %72 = math.exp %71 : vector<8x8xf32>
    %cst_25 = arith.constant dense<0.000000e+00> : vector<8xf32>
    %73 = vector.multi_reduction <add>, %72, %cst_25 [1] : vector<8x8xf32> to vector<8xf32>
    %74 = vector.shape_cast %73 : vector<8xf32> to vector<8x1xf32>
    %75 = tpu.reciprocal %74 {approx = true} : vector<8x1xf32> -> vector<8x1xf32>
    %76 = vector.broadcast %75 : vector<8x1xf32> to vector<8x8xf32>
    %77 = arith.mulf %72, %76 : vector<8x8xf32>
    %78 = arith.truncf %77 : vector<8x8xf32> to vector<8x8xbf16>
    %cst_26 = arith.constant dense<0.000000e+00> : vector<8x8xf32>
    %79 = tpu.matmul %78, %66, %cst_26 {dimension_numbers = #tpu.dot_dimension_numbers<[1], [0], [0], [1], [0, 0, 1, 1], [], []>} : vector<8x8xbf16>, vector<8x8xbf16>, vector<8x8xf32> -> vector<8x8xf32>
    %80 = arith.truncf %79 : vector<8x8xf32> to vector<8x8xbf16>
    %81 = vector.extract_strided_slice %32 {offsets = [8, 0], sizes = [8, 32], strides = [1, 1]} : vector<32x32xbf16> to vector<8x32xbf16>
    %cst_27 = arith.constant dense<0.000000e+00> : vector<8x32xf32>
    %82 = tpu.matmul %80, %81, %cst_27 {dimension_numbers = #tpu.dot_dimension_numbers<[1], [0], [0], [1], [0, 0, 1, 1], [], []>} : vector<8x8xbf16>, vector<8x32xbf16>, vector<8x32xf32> -> vector<8x32xf32>
    %83 = arith.addf %58, %82 : vector<8x32xf32>
    %84 = vector.extract_strided_slice %29 {offsets = [0, 16], sizes = [8, 8], strides = [1, 1]} : vector<8x32xf32> to vector<8x8xf32>
    %cst_28 = arith.constant 0.353553385 : f32
    %85 = vector.broadcast %cst_28 : f32 to vector<8x8xf32>
    %86 = arith.mulf %84, %85 : vector<8x8xf32>
    %87 = arith.truncf %86 : vector<8x8xf32> to vector<8x8xbf16>
    %88 = vector.extract_strided_slice %30 {offsets = [0, 16], sizes = [8, 8], strides = [1, 1]} : vector<8x32xf32> to vector<8x8xf32>
    %89 = arith.truncf %88 : vector<8x8xf32> to vector<8x8xbf16>
    %90 = vector.extract_strided_slice %31 {offsets = [0, 16], sizes = [8, 8], strides = [1, 1]} : vector<8x32xf32> to vector<8x8xf32>
    %91 = arith.truncf %90 : vector<8x8xf32> to vector<8x8xbf16>
    %cst_29 = arith.constant dense<0.000000e+00> : vector<8x8xf32>
    %92 = tpu.matmul %87, %89, %cst_29 {dimension_numbers = #tpu.dot_dimension_numbers<[1], [1], [0], [0], [0, 0, 1, 0], [], []>} : vector<8x8xbf16>, vector<8x8xbf16>, vector<8x8xf32> -> vector<8x8xf32>
    %cst_30 = arith.constant dense<0xFF800000> : vector<8xf32>
    %93 = vector.multi_reduction <maximumf>, %92, %cst_30 [1] : vector<8x8xf32> to vector<8xf32>
    %94 = vector.shape_cast %93 : vector<8xf32> to vector<8x1xf32>
    %95 = vector.broadcast %94 : vector<8x1xf32> to vector<8x8xf32>
    %96 = arith.subf %92, %95 : vector<8x8xf32>
    %97 = math.exp %96 : vector<8x8xf32>
    %cst_31 = arith.constant dense<0.000000e+00> : vector<8xf32>
    %98 = vector.multi_reduction <add>, %97, %cst_31 [1] : vector<8x8xf32> to vector<8xf32>
    %99 = vector.shape_cast %98 : vector<8xf32> to vector<8x1xf32>
    %100 = tpu.reciprocal %99 {approx = true} : vector<8x1xf32> -> vector<8x1xf32>
    %101 = vector.broadcast %100 : vector<8x1xf32> to vector<8x8xf32>
    %102 = arith.mulf %97, %101 : vector<8x8xf32>
    %103 = arith.truncf %102 : vector<8x8xf32> to vector<8x8xbf16>
    %cst_32 = arith.constant dense<0.000000e+00> : vector<8x8xf32>
    %104 = tpu.matmul %103, %91, %cst_32 {dimension_numbers = #tpu.dot_dimension_numbers<[1], [0], [0], [1], [0, 0, 1, 1], [], []>} : vector<8x8xbf16>, vector<8x8xbf16>, vector<8x8xf32> -> vector<8x8xf32>
    %105 = arith.truncf %104 : vector<8x8xf32> to vector<8x8xbf16>
    %106 = vector.extract_strided_slice %32 {offsets = [16, 0], sizes = [8, 32], strides = [1, 1]} : vector<32x32xbf16> to vector<8x32xbf16>
    %cst_33 = arith.constant dense<0.000000e+00> : vector<8x32xf32>
    %107 = tpu.matmul %105, %106, %cst_33 {dimension_numbers = #tpu.dot_dimension_numbers<[1], [0], [0], [1], [0, 0, 1, 1], [], []>} : vector<8x8xbf16>, vector<8x32xbf16>, vector<8x32xf32> -> vector<8x32xf32>
    %108 = arith.addf %83, %107 : vector<8x32xf32>
    %109 = vector.extract_strided_slice %29 {offsets = [0, 24], sizes = [8, 8], strides = [1, 1]} : vector<8x32xf32> to vector<8x8xf32>
    %cst_34 = arith.constant 0.353553385 : f32
    %110 = vector.broadcast %cst_34 : f32 to vector<8x8xf32>
    %111 = arith.mulf %109, %110 : vector<8x8xf32>
    %112 = arith.truncf %111 : vector<8x8xf32> to vector<8x8xbf16>
    %113 = vector.extract_strided_slice %30 {offsets = [0, 24], sizes = [8, 8], strides = [1, 1]} : vector<8x32xf32> to vector<8x8xf32>
    %114 = arith.truncf %113 : vector<8x8xf32> to vector<8x8xbf16>
    %115 = vector.extract_strided_slice %31 {offsets = [0, 24], sizes = [8, 8], strides = [1, 1]} : vector<8x32xf32> to vector<8x8xf32>
    %116 = arith.truncf %115 : vector<8x8xf32> to vector<8x8xbf16>
    %cst_35 = arith.constant dense<0.000000e+00> : vector<8x8xf32>
    %117 = tpu.matmul %112, %114, %cst_35 {dimension_numbers = #tpu.dot_dimension_numbers<[1], [1], [0], [0], [0, 0, 1, 0], [], []>} : vector<8x8xbf16>, vector<8x8xbf16>, vector<8x8xf32> -> vector<8x8xf32>
    %cst_36 = arith.constant dense<0xFF800000> : vector<8xf32>
    %118 = vector.multi_reduction <maximumf>, %117, %cst_36 [1] : vector<8x8xf32> to vector<8xf32>
    %119 = vector.shape_cast %118 : vector<8xf32> to vector<8x1xf32>
    %120 = vector.broadcast %119 : vector<8x1xf32> to vector<8x8xf32>
    %121 = arith.subf %117, %120 : vector<8x8xf32>
    %122 = math.exp %121 : vector<8x8xf32>
    %cst_37 = arith.constant dense<0.000000e+00> : vector<8xf32>
    %123 = vector.multi_reduction <add>, %122, %cst_37 [1] : vector<8x8xf32> to vector<8xf32>
    %124 = vector.shape_cast %123 : vector<8xf32> to vector<8x1xf32>
    %125 = tpu.reciprocal %124 {approx = true} : vector<8x1xf32> -> vector<8x1xf32>
    %126 = vector.broadcast %125 : vector<8x1xf32> to vector<8x8xf32>
    %127 = arith.mulf %122, %126 : vector<8x8xf32>
    %128 = arith.truncf %127 : vector<8x8xf32> to vector<8x8xbf16>
    %cst_38 = arith.constant dense<0.000000e+00> : vector<8x8xf32>
    %129 = tpu.matmul %128, %116, %cst_38 {dimension_numbers = #tpu.dot_dimension_numbers<[1], [0], [0], [1], [0, 0, 1, 1], [], []>} : vector<8x8xbf16>, vector<8x8xbf16>, vector<8x8xf32> -> vector<8x8xf32>
    %130 = arith.truncf %129 : vector<8x8xf32> to vector<8x8xbf16>
    %131 = vector.extract_strided_slice %32 {offsets = [24, 0], sizes = [8, 32], strides = [1, 1]} : vector<32x32xbf16> to vector<8x32xbf16>
    %cst_39 = arith.constant dense<0.000000e+00> : vector<8x32xf32>
    %132 = tpu.matmul %130, %131, %cst_39 {dimension_numbers = #tpu.dot_dimension_numbers<[1], [0], [0], [1], [0, 0, 1, 1], [], []>} : vector<8x8xbf16>, vector<8x32xbf16>, vector<8x32xf32> -> vector<8x32xf32>
    %133 = arith.addf %108, %132 : vector<8x32xf32>
    %134 = arith.addf %1, %133 : vector<8x32xf32>
    %c0_40 = arith.constant 0 : index
    %c0_41 = arith.constant 0 : index
    %135 = vector.load %arg6[%c0_40, %c0_41] : memref<1x32xf32, #tpu.memory_space<vmem>>, vector<1x32xf32>
    %136 = vector.broadcast %135 : vector<1x32xf32> to vector<8x32xf32>
    %137 = arith.addf %134, %136 : vector<8x32xf32>
    %c0_42 = arith.constant 0 : index
    %c0_43 = arith.constant 0 : index
    %138 = vector.load %arg7[%c0_42, %c0_43] : memref<1x32xf32, #tpu.memory_space<vmem>>, vector<1x32xf32>
    %c0_44 = arith.constant 0 : index
    %c0_45 = arith.constant 0 : index
    %139 = vector.load %arg8[%c0_44, %c0_45] : memref<1x32xf32, #tpu.memory_space<vmem>>, vector<1x32xf32>
    %cst_46 = arith.constant dense<0.000000e+00> : vector<8xf32>
    %140 = vector.multi_reduction <add>, %137, %cst_46 [1] : vector<8x32xf32> to vector<8xf32>
    %141 = vector.shape_cast %140 : vector<8xf32> to vector<8x1xf32>
    %cst_47 = arith.constant 3.200000e+01 : f32
    %142 = vector.broadcast %cst_47 : f32 to vector<8x1xf32>
    %143 = arith.divf %141, %142 : vector<8x1xf32>
    %144 = vector.broadcast %143 : vector<8x1xf32> to vector<8x32xf32>
    %145 = arith.subf %137, %144 : vector<8x32xf32>
    %146 = arith.mulf %145, %145 : vector<8x32xf32>
    %cst_48 = arith.constant dense<0.000000e+00> : vector<8xf32>
    %147 = vector.multi_reduction <add>, %146, %cst_48 [1] : vector<8x32xf32> to vector<8xf32>
    %148 = vector.shape_cast %147 : vector<8xf32> to vector<8x1xf32>
    %cst_49 = arith.constant 3.200000e+01 : f32
    %149 = vector.broadcast %cst_49 : f32 to vector<8x1xf32>
    %150 = arith.divf %148, %149 : vector<8x1xf32>
    %151 = vector.broadcast %143 : vector<8x1xf32> to vector<8x32xf32>
    %152 = arith.subf %137, %151 : vector<8x32xf32>
    %cst_50 = arith.constant 9.99999974E-6 : f32
    %153 = vector.broadcast %cst_50 : f32 to vector<8x1xf32>
    %154 = arith.addf %150, %153 : vector<8x1xf32>
    %155 = math.rsqrt %154 : vector<8x1xf32>
    %156 = vector.broadcast %155 : vector<8x1xf32> to vector<8x32xf32>
    %157 = arith.mulf %152, %156 : vector<8x32xf32>
    %158 = vector.broadcast %138 : vector<1x32xf32> to vector<8x32xf32>
    %159 = arith.mulf %157, %158 : vector<8x32xf32>
    %160 = vector.broadcast %139 : vector<1x32xf32> to vector<8x32xf32>
    %161 = arith.addf %159, %160 : vector<8x32xf32>
    %162 = arith.truncf %161 : vector<8x32xf32> to vector<8x32xbf16>
    %c0_51 = arith.constant 0 : index
    %c0_52 = arith.constant 0 : index
    %163 = vector.load %arg9[%c0_51, %c0_52] : memref<32x128xbf16, #tpu.memory_space<vmem>>, vector<32x128xbf16>
    %cst_53 = arith.constant dense<0.000000e+00> : vector<8x128xf32>
    %164 = tpu.matmul %162, %163, %cst_53 {dimension_numbers = #tpu.dot_dimension_numbers<[1], [0], [0], [1], [0, 0, 1, 1], [], []>} : vector<8x32xbf16>, vector<32x128xbf16>, vector<8x128xf32> -> vector<8x128xf32>
    %c0_54 = arith.constant 0 : index
    %c0_55 = arith.constant 0 : index
    %165 = vector.load %arg10[%c0_54, %c0_55] : memref<1x128xf32, #tpu.memory_space<vmem>>, vector<1x128xf32>
    %166 = vector.broadcast %165 : vector<1x128xf32> to vector<8x128xf32>
    %167 = arith.addf %164, %166 : vector<8x128xf32>
    %cst_56 = arith.constant 5.000000e-01 : f32
    %168 = vector.broadcast %cst_56 : f32 to vector<8x128xf32>
    %169 = arith.mulf %168, %167 : vector<8x128xf32>
    %cst_57 = arith.constant 0.707106769 : f32
    %170 = vector.broadcast %cst_57 : f32 to vector<8x128xf32>
    %171 = arith.mulf %167, %170 : vector<8x128xf32>
    %172 = math.erf %171 : vector<8x128xf32>
    %cst_58 = arith.constant 1.000000e+00 : f32
    %173 = vector.broadcast %cst_58 : f32 to vector<8x128xf32>
    %174 = arith.addf %173, %172 : vector<8x128xf32>
    %175 = arith.mulf %169, %174 : vector<8x128xf32>
    %176 = arith.truncf %175 : vector<8x128xf32> to vector<8x128xbf16>
    %c0_59 = arith.constant 0 : index
    %c0_60 = arith.constant 0 : index
    %177 = vector.load %arg11[%c0_59, %c0_60] : memref<128x32xbf16, #tpu.memory_space<vmem>>, vector<128x32xbf16>
    %cst_61 = arith.constant dense<0.000000e+00> : vector<8x32xf32>
    %178 = tpu.matmul %176, %177, %cst_61 {dimension_numbers = #tpu.dot_dimension_numbers<[1], [0], [0], [1], [0, 0, 1, 1], [], []>} : vector<8x128xbf16>, vector<128x32xbf16>, vector<8x32xf32> -> vector<8x32xf32>
    %c0_62 = arith.constant 0 : index
    %c0_63 = arith.constant 0 : index
    %179 = vector.load %arg12[%c0_62, %c0_63] : memref<1x32xf32, #tpu.memory_space<vmem>>, vector<1x32xf32>
    %180 = vector.broadcast %179 : vector<1x32xf32> to vector<8x32xf32>
    %181 = arith.addf %178, %180 : vector<8x32xf32>
    %182 = arith.addf %137, %181 : vector<8x32xf32>
    %c0_64 = arith.constant 0 : index
    %c0_65 = arith.constant 0 : index
    %c0_66 = arith.constant 0 : index
    %183 = vector.load %arg13[%c0_64, %c0_65, %c0_66] : memref<1x8x32xf32, #tpu.memory_space<vmem>>, vector<1x8x32xf32>
    %184 = vector.shape_cast %183 : vector<1x8x32xf32> to vector<8x32xf32>
    %185 = vector.shape_cast %182 : vector<8x32xf32> to vector<1x8x32xf32>
    tpu.vector_store %arg13[%c0_64, %c0_65, %c0_66], %185 {strides = array<i32>} : memref<1x8x32xf32, #tpu.memory_space<vmem>>, vector<1x8x32xf32>,
    return
  }
  func.func @transform_0(%arg0: i32) -> (i32, i32, i32) {
    %c0_i32 = arith.constant 0 : i32
    %c0_i32_0 = arith.constant 0 : i32
    %c0_i32_1 = arith.constant 0 : i32
    return %arg0, %c0_i32, %c0_i32_0 : i32, i32, i32
  }
  func.func @transform_1(%arg0: i32) -> (i32, i32) {
    %c0_i32 = arith.constant 0 : i32
    %c0_i32_0 = arith.constant 0 : i32
    %c0_i32_1 = arith.constant 0 : i32
    return %c0_i32, %c0_i32_0 : i32, i32
  }
  func.func @transform_2(%arg0: i32) -> (i32, i32) {
    %c0_i32 = arith.constant 0 : i32
    %c0_i32_0 = arith.constant 0 : i32
    %c0_i32_1 = arith.constant 0 : i32
    return %c0_i32, %c0_i32_0 : i32, i32
  }
  func.func @transform_3(%arg0: i32) -> (i32, i32) {
    %c0_i32 = arith.constant 0 : i32
    %c0_i32_0 = arith.constant 0 : i32
    %c0_i32_1 = arith.constant 0 : i32
    return %c0_i32, %c0_i32_0 : i32, i32
  }
  func.func @transform_4(%arg0: i32) -> (i32, i32) {
    %c0_i32 = arith.constant 0 : i32
    %c0_i32_0 = arith.constant 0 : i32
    %c0_i32_1 = arith.constant 0 : i32
    return %c0_i32, %c0_i32_0 : i32, i32
  }
  func.func @transform_5(%arg0: i32) -> (i32, i32) {
    %c0_i32 = arith.constant 0 : i32
    %c0_i32_0 = arith.constant 0 : i32
    %c0_i32_1 = arith.constant 0 : i32
    return %c0_i32, %c0_i32_0 : i32, i32
  }
  func.func @transform_6(%arg0: i32) -> (i32, i32) {
    %c0_i32 = arith.constant 0 : i32
    %c0_i32_0 = arith.constant 0 : i32
    %c0_i32_1 = arith.constant 0 : i32
    return %c0_i32, %c0_i32_0 : i32, i32
  }
  func.func @transform_7(%arg0: i32) -> (i32, i32) {
    %c0_i32 = arith.constant 0 : i32
    %c0_i32_0 = arith.constant 0 : i32
    %c0_i32_1 = arith.constant 0 : i32
    return %c0_i32, %c0_i32_0 : i32, i32
  }
  func.func @transform_8(%arg0: i32) -> (i32, i32) {
    %c0_i32 = arith.constant 0 : i32
    %c0_i32_0 = arith.constant 0 : i32
    %c0_i32_1 = arith.constant 0 : i32
    return %c0_i32, %c0_i32_0 : i32, i32
  }
  func.func @transform_9(%arg0: i32) -> (i32, i32) {
    %c0_i32 = arith.constant 0 : i32
    %c0_i32_0 = arith.constant 0 : i32
    %c0_i32_1 = arith.constant 0 : i32
    return %c0_i32, %c0_i32_0 : i32, i32
  }
  func.func @transform_10(%arg0: i32) -> (i32, i32) {
    %c0_i32 = arith.constant 0 : i32
    %c0_i32_0 = arith.constant 0 : i32
    %c0_i32_1 = arith.constant 0 : i32
    return %c0_i32, %c0_i32_0 : i32, i32
  }
  func.func @transform_11(%arg0: i32) -> (i32, i32) {
    %c0_i32 = arith.constant 0 : i32
    %c0_i32_0 = arith.constant 0 : i32
    %c0_i32_1 = arith.constant 0 : i32
    return %c0_i32, %c0_i32_0 : i32, i32
  }
  func.func @transform_12(%arg0: i32) -> (i32, i32, i32) {
    %c0_i32 = arith.constant 0 : i32
    %c0_i32_0 = arith.constant 0 : i32
    %c0_i32_1 = arith.constant 0 : i32
    return %arg0, %c0_i32, %c0_i32_0 : i32, i32, i32
  }
}

</mosaic_0001>

<bundles_post_ra>
// kernel: tpu_custom_call.1
= control target key start
LH: loop header
LB: loop body
LE: loop exit
PB: predicated region body
PF: predicated region fallthrough
CT: control target
= control target key end

     0   :  { %s1607_s0 = inlined_call_operand.vmem [shape: f32[2,8,32], index: 0, kind: input, shape index: {}]   ;;  %s1608_s1 = inlined_call_operand.vmem [shape: f32[1,32], index: 1, kind: input, shape index: {}]   ;;  %s1609_s2 = inlined_call_operand.vmem [shape: f32[1,32], index: 2, kind: input, shape index: {}]   ;;  %s1610_s3 = inlined_call_operand.vmem [shape: bf16[32,96], index: 3, kind: input, shape index: {}]   ;;  %s1611_s4 = inlined_call_operand.vmem [shape: bf16[32,32], index: 4, kind: input, shape index: {}]   ;;  %s1612_s5 = inlined_call_operand.vmem [shape: f32[1,32], index: 5, kind: input, shape index: {}]   ;;  %s1613_s6 = inlined_call_operand.vmem [shape: f32[1,32], index: 6, kind: input, shape index: {}]   ;;  %s1614_s7 = inlined_call_operand.vmem [shape: f32[1,32], index: 7, kind: input, shape index: {}]   ;;  %s1615_s8 = inlined_call_operand.vmem [shape: bf16[32,128], index: 8, kind: input, shape index: {}]   ;;  %s1616_s9 = inlined_call_operand.vmem [shape: f32[1,128], index: 9, kind: input, shape index: {}]   ;;  %s1617_s10 = inlined_call_operand.vmem [shape: bf16[128,32], index: 10, kind: input, shape index: {}]   ;;  %s1618_s11 = inlined_call_operand.vmem [shape: f32[1,32], index: 11, kind: input, shape index: {}]   ;;  %s1619_s12 = inlined_call_operand.hbm [shape: f32[2,8,32], index: 12, kind: output, shape index: {}]  }
   0x1   :  { %1620 = sst [smem:[#allocation5_spill]] %s1607_s0 }
   0x2   :  { %1621 = sst [smem:[#allocation6_spill]] %s1608_s1 }
   0x3   :  { %1622 = sst [smem:[#allocation7_spill]] %s1609_s2 }
   0x4   :  { %17 = vsyncpa [#allocation3], 0 }
   0x5   :  { %19 = vsyncpa [#allocation3 + $0x1], 0  ;;  %s1385_s21 = smov 0   ;;  %s1387_s22 = smov 0  }
   0x6   :  { %s1389_s23 = smov 0   ;;  %s1391_s24 = smov 0  }
   0x7 LB: > { %s1406_s25 = sadd.s32 4294967295, %s1306_s24   ;;  %s1077_s26 = sadd.s32 4294967294, %s1306_s24   ;;  %s1306_s24 = sphi %s1391_s24, %s1631_s24   ;;  %s1302_s23 = sphi %s1389_s23, %s1630_s23   ;;  %s1298_s22 = sphi %s1387_s22, %s1629_s22   ;;  %s1294_s21 = sphi %s1385_s21, %s1628_s21  }
   0x8   : > { %s1410_s27 = sadd.s32 1, %s1306_s24   ;;  %s289_s28 = sadd.s32 1, %s1302_s23 }
   0x9   : > { %s286_s29 = ssub.s32 %s1306_s24, %s1410_s27  ;;  %p299_p0 = scmp.ne.s32.totalorder %s1302_s23, %s1298_s22 }
   0xa   : > { %p287_p1 = scmp.eq.s32.totalorder %s286_s29, 0  ;;  %p300_p2 = scmp.eq.s32.totalorder %s1406_s25, 1 }
   0xb   : > { %p305_p3 = scmp.ne.s32.totalorder %s1298_s22, %s1294_s21  ;;  %p306_p4 = scmp.eq.s32.totalorder %s1077_s26, 1 }
   0xc   : > { %s1421_s30 = scalar_select %p287_p1, %s1302_s23, %s289_s28  }
   0xd   : > { %p1423_p5 = por %p300_p2, %p299_p0  ;;  %p1427_p6 = por %p306_p4, %p305_p3 }
   0xe   : > { %p1080_p7 = scmp.ge.s32.totalorder %s1306_s24, 1  ;;  %p364_p8 = scmp.lt.s32.totalorder %s1306_s24, 3 }
  0x10   : > { %p365_p9 = pnand %p1080_p7, %p364_p8 }
  0x11   : > { %p405_p10 = scmp.lt.s32.totalorder (!%p365_p9), %s1406_s25, 1  ;;  %s1625_s0 = sld [smem:[#allocation5_spill]] (!%p365_p9) }
  0x12   : > { %368 = sbr.rel (%p365_p9) target bundleno = 2327 (0x917), region = 68  ;;  %s1626_s1 = sld [smem:[#allocation6_spill]] (!%p365_p9) }
  0x13   : > { %s1627_s2 = sld [smem:[#allocation7_spill]] (!%p365_p9)  ;;  %s1310_s20 = smov (!%p365_p9), 96  }
  0x14   : > { %s1311_s26 = smov (!%p365_p9), 80   ;;  %s1312_s28 = smov (!%p365_p9), 112  }
  0x15   : > { %s1313_s29 = smov (!%p365_p9), 64   ;;  %s1316_s17 = smov (!%p365_p9), 104  }
  0x17   : > { %s406_s15 = scalar_select %p405_p10, %s1406_s25, 1  ;;  %vm413_vm0 = vcmask 261120   ;;  %v1308_v2 = vmov 32.0   ;;  %v1151_v14 = vld [vmem:[%s1610_s3 + $0x8] sm:$0xff]  ;;  %v1150_v15 = vld [vmem:[%s1610_s3] sm:$0xff]  ;;  %vm494_vm5 = vcmask 64512  }
  0x18   : > { %1220 = vrcp.f32 %v1308_v2  ;;  %477 = vmatpush.bf16.msra.mxu0 %v1151_v14  ;;  %v1213_v25 = vld [vmem:[%s1626_s1] ss:$0 sm:$0xff]  ;;  %vm531_vm6 = vcmask 1043456  }
  0x19   : > { %s1082_s16 = sshll.u32 %s406_s15, 3  ;;  %v1214_v28 = vld [vmem:[%s1627_s2] ss:$0 sm:$0xff]  ;;  %s1314_s15 = smov 120  }
  0x1a   : > { %s408_s19 = scalar_lea.vmem %s1625_s0, %s1082_s16  ;;  %s1315_s16 = smov 72   ;;  %v484_v51 = vld [vmem:[%s1611_s4] sm:$0xf] }
  0x1b   : > { %v1438_v0 = vld [vmem:[%s408_s19] sm:$0xff]  ;;  %s1309_s19 = smov 88   ;;  %v630_v52 = vsel %vm531_vm6, %v484_v51, 0 }
  0x1c   : > { %v414_v1 = vsel %vm413_vm0, %v1438_v0, 0.0  ;;  %478 = vmatpush.bf16.msra.mxu0 %v1150_v15  ;;  %639 = vmatpush.bf16.msra.mxu1 %v630_v52 }
  0x1d   : > { %415 = vadd.xlane.f32.xlu0 %v414_v1 }
  0x1e   : > { %v1221_v3 = vpop.eup %1220 }
  0x1f   : > { %v418_v4 = vmul.f32 32.0, %v1221_v3  ;;  %vm422_vm1 = vweird.f32 %v1221_v3 }
  0x21   : > { %v419_v5 = vsub.f32 1.0, %v418_v4 }
  0x23   : > { %v420_v6 = vmul.f32 %v1221_v3, %v419_v5 }
  0x25   : > { %v421_v7 = vadd.f32 %v1221_v3, %v420_v6 }
  0x27   : > { %v1442_v8 = vsel %vm422_vm1, %v1221_v3, %v421_v7 }
  0x90   : > { %v416_v9 = vpop.xlane.xlu0 %415 }
  0x91   : > { %v424_v10 = vmul.f32 %v1442_v8, %v416_v9 }
  0x93   : > { %v425_v11 = vsub.f32 %v1438_v0, %v424_v10 }
  0x95   : > { %v426_v12 = vmul.f32 %v425_v11, %v425_v11 }
  0x97   : > { %v427_v13 = vsel %vm413_vm0, %v426_v12, 0.0 }
  0x98   : > { %428 = vadd.xlane.f32.xlu0 %v427_v13 }
 0x10b   : > { %v429_v16 = vpop.xlane.xlu0 %428 }
 0x10c   : > { %v430_v17 = vmul.f32 %v429_v16, %v1442_v8 }
 0x10e   : > { %v431_v18 = vadd.f32 1e-05, %v430_v17 }
 0x110   : > { %1222 = vrsqrt.f32 %v431_v18  ;;  %vm438_vm3 = vweird.f32 %v431_v18 }
 0x116   : > { %v1223_v19 = vpop.eup %1222 }
 0x117   : > { %v433_v20 = vmul.f32 %v1223_v19, %v431_v18  ;;  %vm439_vm2 = vweird.f32 %v1223_v19 }
 0x118   : > { %vm440_vm4 = vmor %vm438_vm3, %vm439_vm2 }
 0x119   : > { %v434_v21 = vmul.f32 %v1223_v19, %v433_v20 }
 0x11b   : > { %v435_v22 = vmul.f32 0.5, %v434_v21 }
 0x11d   : > { %v436_v23 = vsub.f32 1.5, %v435_v22 }
 0x11f   : > { %v437_v24 = vmul.f32 %v1223_v19, %v436_v23 }
 0x121   : > { %v441_v26 = vsel %vm440_vm4, %v1223_v19, %v437_v24 }
 0x122   : > { %v442_v27 = vmul.f32 %v441_v26, %v425_v11 }
 0x124   : > { %v446_v29 = vmul.f32 %v1213_v25, %v442_v27 }
 0x126   : > { %v450_v30 = vadd.f32 %v1214_v28, %v446_v29 }
 0x128   : > { %v451_v31 = vpack.c.bf16 %v450_v30, %v450_v30 }
 0x12a   : > { %1091 = vmatmul.msk.bf16.vlgmr.msra.gmra.mxu0 %vm413_vm0, %v451_v31 }
 0x1a7   : > { %v480_v32 = vpop.f32.mrf.mxu0 }
 0x1a8   : > { %v1461_v33 = vpack.c.bf16 %v480_v32, %v480_v32  ;;  %v488_v35 = vmul.f32 0.35355338, %v480_v32 }
 0x1aa   : > { %552 = vrot.lane.b32.xlu0 %v1461_v33, %s1309_s19  ;;  %492 = vrot.lane.b32.xlu1 %v1461_v33, %s1310_s20  ;;  %v489_v36 = vpack.c.bf16 %v488_v35, %v488_v35  ;;  %s1317_s20 = smov 40  }
 0x1af   : > { %v482_v34 = vpop.f32.mrf.mxu0 }
 0x1b2   : > { %647 = vrot.lane.b32.xlu0 %v1461_v33, %s1311_s26  ;;  %s1318_s26 = smov 56  }
 0x1ba   : > { %645 = vrot.lane.b32.xlu0 %v489_v36, %s1312_s28  ;;  %s1319_s28 = smov 48  }
 0x21c   : > { %v553_v37 = vpop.permute.xlu0 %552  ;;  %v493_v38 = vpop.permute.xlu1 %492 }
 0x21d   : > { %v499_v39 = vsel %vm494_vm5, %v493_v38, 0  ;;  %v558_v40 = vsel %vm494_vm5, %v553_v37, 0 }
 0x21e   : > { %508 = vmatpush.bf16.xpose.msra.mxu3 %v499_v39 }
 0x224   : > { %v648_v41 = vpop.permute.xlu0 %647 }
 0x225   : > { %v653_v42 = vsel %vm494_vm5, %v648_v41, 0  ;;  %1092 = vmatmul.msk.bf16.vlgmr.msra.gmra.mxu3 %vm494_vm5, %v489_v36 }
 0x226   : > { %567 = vmatpush.bf16.xpose.msrb.mxu3 %v558_v40 }
 0x22c   : > { %v646_v62 = vpop.permute.xlu0 %645 }
 0x22e   : > { %662 = vmatpush.bf16.xpose.msra.mxu3 %v653_v42 }
 0x2a8   : > { %v510_v43 = vpop.f32.mrf.mxu3 }
 0x2a9   : > { %v514_v44 = vsel %vm494_vm5, %v510_v43, -inf }
 0x2aa   : > { %515 = vmax.xlane.f32.xlu1 %v514_v44 }
 0x2b0   : > { %v512_v45 = vpop.f32.mrf.mxu3 }
 0x2b1   : > { %v485_v45 = vld [vmem:[%s1611_s4 + $0x4] sm:$0xf] }
 0x31d   : > { %v516_v46 = vpop.xlane.xlu1 %515 }
 0x31e   : > { %v517_v47 = vsub.f32 %v510_v43, %v516_v46  ;;  %v611_v46 = vsel %vm531_vm6, %v485_v45, 0 }
 0x31f   : > { %620 = vmatpush.bf16.msrb.mxu0 %v611_v46 }
 0x320   : > { %v518_v48 = vmul.f32 1.442695, %v517_v47 }
 0x322   : > { %1224 = vpow2.f32 %v518_v48  ;;  %v486_v48 = vld [vmem:[%s1611_s4 + $0x8] sm:$0xf] }
 0x328   : > { %v1225_v49 = vpop.eup %1224 }
 0x329   : > { %v520_v50 = vsel %vm494_vm5, %v1225_v49, 0.0 }
 0x32a   : > { %521 = vadd.xlane.f32.xlu2 %v520_v50 }
 0x342   : > { %526 = vrot.lane.b32.xlu2 %v1461_v33, %s1313_s29  ;;  %s1147_s29 = sshll.u32 %s1406_s25, 3 }
 0x343   : > { %s1013_s19 = scalar_lea.hbm %s1619_s12, %s1147_s29 }
 0x344   : > { %s1017_s1 = sshll.u32 %s1013_s19, 4  ;;  %s1018_s1 = int_to_ptr.hbm [resolvable:$true] %s1017_s1 }
 0x345   : > { %s1258_s2 = sshra.s32 %s1018_s1, 4  ;;  %s1259_s2 = int_to_ptr.hbm [resolvable:$true] %s1258_s2 }
 0x346   : > { %p1265_p0 = scmp.lt.s32.totalorder %s1259_s2, %s1619_s12 }
 0x34a   : > { %550 = vrot.lane.b32.xlu2 %v489_v36, %s1314_s15  ;;  %s1260_s15 = scalar_lea.hbm %s1259_s2, 8 }
 0x34b   : > { %p1261_p11 = scmp.ne.s32.totalorder %s1259_s2, %s1260_s15 }
 0x34d   : > { %p1262_p12 = pnand %p1261_p11, %p1423_p5 }
 0x34f   : > { %p1263_p13 = pneg %p1262_p12 }
 0x352   : > { %724 = vrot.lane.b32.xlu2 %v1461_v33, %s1315_s16 }
 0x35a   : > { %722 = vrot.lane.b32.xlu2 %v489_v36, %s1316_s17 }
 0x39d   : > { %v522_v53 = vpop.xlane.xlu2 %521 }
 0x39e   : > { %1226 = vrcp.f32 %v522_v53  ;;  %v487_v53 = vld [vmem:[%s1611_s4 + $0xc] sm:$0xf] }
 0x3a4   : > { %v1227_v54 = vpop.eup %1226 }
 0x3a5   : > { %v527_v55 = vpop.permute.xlu2 %526  ;;  %v524_v56 = vmul.f32 %v1227_v54, %v1225_v49  ;;  %v706_v49 = vsel %vm531_vm6, %v486_v48, 0  ;;  %v783_v54 = vsel %vm531_vm6, %v487_v53, 0 }
 0x3a6   : > { %v533_v57 = vsel %vm531_vm6, %v527_v55, 0  ;;  %715 = vmatpush.bf16.msra.mxu0 %v706_v49 }
 0x3a7   : > { %542 = vmatpush.bf16.msra.mxu2 %v533_v57  ;;  %v525_v58 = vpack.c.bf16 %v524_v56, %v524_v56 }
 0x3aa   : > { %1093 = vmatmul.msk.bf16.vlgmr.msra.gmra.mxu2 %vm494_vm5, %v525_v58 }
 0x3ad   : > { %v551_v59 = vpop.permute.xlu2 %550 }
 0x3ae   : > { %1094 = vmatmul.msk.bf16.vlgmr.msrb.gmra.mxu3 %vm494_vm5, %v551_v59 }
 0x3b5   : > { %v725_v60 = vpop.permute.xlu2 %724 }
 0x3b6   : > { %v730_v61 = vsel %vm494_vm5, %v725_v60, 0 }
 0x3b7   : > { %739 = vmatpush.bf16.xpose.msrb.mxu1 %v730_v61 }
 0x3bd   : > { %v723_v6 = vpop.permute.xlu2 %722 }
 0x3be   : > { %1098 = vmatmul.msk.bf16.vlgmr.msra.gmra.mxu3 %vm494_vm5, %v646_v62 }
 0x42d   : > { %v544_v63 = vpop.f32.mrf.mxu2 }
 0x42e   : > { %v548_v1 = vpack.c.bf16 %v544_v63, %v544_v63 }
 0x430   : > { %1097 = vmatmul.msk.bf16.vlgmr.msra.gmra.mxu1 %vm494_vm5, %v548_v1 }
 0x431   : > { %v569_v2 = vpop.f32.mrf.mxu3 }
 0x432   : > { %v573_v3 = vsel %vm494_vm5, %v569_v2, -inf }
 0x433   : > { %574 = vmax.xlane.f32.xlu1 %v573_v3 }
 0x435   : > { %v546_v4 = vpop.f32.mrf.mxu2 }
 0x439   : > { %v571_v5 = vpop.f32.mrf.mxu3 }
 0x440   : > { %1101 = vmatmul.msk.bf16.vlgmr.msrb.gmra.mxu1 %vm494_vm5, %v723_v6 }
 0x441   : > { %v664_v7 = vpop.f32.mrf.mxu3 }
 0x442   : > { %v668_v9 = vsel %vm494_vm5, %v664_v7, -inf }
 0x443   : > { %669 = vmax.xlane.f32.xlu2 %v668_v9 }
 0x449   : > { %v666_v10 = vpop.f32.mrf.mxu3 }
 0x44a   : > { %v1215_v10 = vld [vmem:[%s1612_s5] ss:$0 sm:$0xff] }
 0x45b   : > { %757 = vrot.lane.b32.xlu2 %v1461_v33, %s1317_s20 }
 0x4a6   : > { %v575_v11 = vpop.xlane.xlu1 %574 }
 0x4a7   : > { %v576_v12 = vsub.f32 %v569_v2, %v575_v11 }
 0x4a9   : > { %v577_v13 = vmul.f32 1.442695, %v576_v12 }
 0x4ab   : > { %1228 = vpow2.f32 %v577_v13 }
 0x4ad   : > { %v1488_v14 = vpop.f32.mrf.mxu1 }
 0x4b1   : > { %v1229_v15 = vpop.eup %1228 }
 0x4b2   : > { %v579_v16 = vsel %vm494_vm5, %v1229_v15, 0.0 }
 0x4b3   : > { %580 = vadd.xlane.f32.xlu1 %v579_v16 }
 0x4b5   : > { %v643_v17 = vpop.f32.mrf.mxu1 }
 0x4b6   : > { %v670_v18 = vpop.xlane.xlu2 %669 }
 0x4b7   : > { %v671_v19 = vsub.f32 %v664_v7, %v670_v18 }
 0x4b9   : > { %v672_v20 = vmul.f32 1.442695, %v671_v19 }
 0x4bb   : > { %1230 = vpow2.f32 %v672_v20  ;;  %v1152_v20 = vld [vmem:[%s1615_s8] sm:$0xff] }
 0x4bd   : > { %v741_v21 = vpop.f32.mrf.mxu1 }
 0x4be   : > { %v758_v22 = vpop.permute.xlu2 %757  ;;  %v745_v23 = vsel %vm494_vm5, %v741_v21, -inf }
 0x4bf   : > { %v763_v24 = vsel %vm531_vm6, %v758_v22, 0  ;;  %746 = vmax.xlane.f32.xlu0 %v745_v23 }
 0x4c0   : > { %772 = vmatpush.bf16.msrb.mxu3 %v763_v24 }
 0x4c1   : > { %v1231_v25 = vpop.eup %1230 }
 0x4c2   : > { %v674_v27 = vsel %vm494_vm5, %v1231_v25, 0.0 }
 0x4c5   : > { %v743_v26 = vpop.f32.mrf.mxu1 }
 0x4c7   : > { %675 = vadd.xlane.f32.xlu0 %v674_v27 }
 0x4cc   : > { %585 = vrot.lane.b32.xlu1 %v1461_v33, %s1318_s26  ;;  %s402_s26 = sand.u32 1, %s1298_s22  }
 0x4cd   : > { %s1003_s25 = scalar_lea.sflag [#allocation3], %s402_s26 }
 0x4db   : > { %680 = vrot.lane.b32.xlu0 %v1461_v33, %s1319_s28  ;;  %s1081_s28 = sshll.u32 %s402_s26, 3 }
 0x4dc   : > { %s404_s20 = scalar_lea.vmem [#allocation2], %s1081_s28  ;;  %s1264_s28 = scalar_lea.hbm %s1619_s12, 16 }
 0x4dd   : > { %s1015_s0 = sshll.u32 %s404_s20, 4  ;;  %p1266_p1 = scmp.lt.s32.totalorder %s1264_s28, %s1260_s15  ;;  %s1016_s0 = int_to_ptr.vmem [resolvable:$true] %s1015_s0 }
 0x4df   : > { %p1267_p2 = por %p1266_p1, %p1265_p0 }
 0x4e1   : > { %p1268_p3 = pnand %p1267_p2, %p1263_p13 }
 0x526   : > { %v581_v28 = vpop.xlane.xlu1 %580 }
 0x527   : > { %1232 = vrcp.f32 %v581_v28 }
 0x52d   : > { %v1233_v32 = vpop.eup %1232 }
 0x52e   : > { %v583_v35 = vmul.f32 %v1233_v32, %v1229_v15 }
 0x530   : > { %v584_v40 = vpack.c.bf16 %v583_v35, %v583_v35 }
 0x532   : > { %v747_v29 = vpop.xlane.xlu0 %746 }
 0x533   : > { %v748_v30 = vsub.f32 %v741_v21, %v747_v29 }
 0x535   : > { %v749_v31 = vmul.f32 1.442695, %v748_v30  ;;  %v1216_v30 = vld [vmem:[%s1613_s6] ss:$0 sm:$0xff] }
 0x537   : > { %1234 = vpow2.f32 %v749_v31 }
 0x53a   : > { %v676_v39 = vpop.xlane.xlu0 %675 }
 0x53b   : > { %1236 = vrcp.f32 %v676_v39  ;;  %v1218_v39 = vld [vmem:[%s1616_s9] ss:$0 sm:$0xff] }
 0x53d   : > { %v1235_v34 = vpop.eup %1234 }
 0x53e   : > { %v586_v36 = vpop.permute.xlu1 %585  ;;  %v751_v37 = vsel %vm494_vm5, %v1235_v34, 0.0 }
 0x53f   : > { %752 = vadd.xlane.f32.xlu1 %v751_v37  ;;  %v591_v38 = vsel %vm531_vm6, %v586_v36, 0  ;;  %v1161_v37 = vld [vmem:[%s1617_s10 + $0x38] sm:$0xff] }
 0x540   : > { %600 = vmatpush.bf16.msrb.mxu2 %v591_v38  ;;  %987 = vmatpush.bf16.msra.mxu1 %v1161_v37  ;;  %v1160_v38 = vld [vmem:[%s1617_s10 + $0x30] sm:$0xff] }
 0x541   : > { %v1237_v33 = vpop.eup %1236 }
 0x542   : > { %v678_v41 = vmul.f32 %v1237_v33, %v1231_v25  ;;  %v1159_v33 = vld [vmem:[%s1617_s10 + $0x28] sm:$0xff] }
 0x543   : > { %1095 = vmatmul.msk.bf16.vlgmr.msrb.gmra.mxu2 %vm494_vm5, %v584_v40 }
 0x544   : > { %v679_v44 = vpack.c.bf16 %v678_v41, %v678_v41  ;;  %988 = vmatpush.bf16.msra.mxu1 %v1160_v38 }
 0x548   : > { %989 = vmatpush.bf16.msra.mxu1 %v1159_v33 }
 0x54d   : > { %v681_v42 = vpop.permute.xlu0 %680 }
 0x54e   : > { %v686_v43 = vsel %vm531_vm6, %v681_v42, 0 }
 0x54f   : > { %695 = vmatpush.bf16.msra.mxu2 %v686_v43  ;;  %v1158_v43 = vld [vmem:[%s1617_s10 + $0x20] sm:$0xff] }
 0x550   : > { %990 = vmatpush.bf16.msra.mxu1 %v1158_v43 }
 0x553   : > { %1099 = vmatmul.msk.bf16.vlgmr.msra.gmra.mxu2 %vm494_vm5, %v679_v44 }
 0x554   : > { %792 = vmatpush.bf16.msrb.mxu2 %v783_v54 }
 0x5b2   : > { %v753_v47 = vpop.xlane.xlu1 %752 }
 0x5b3   : > { %1238 = vrcp.f32 %v753_v47  ;;  %v1157_v47 = vld [vmem:[%s1617_s10 + $0x18] sm:$0xff] }
 0x5b4   : > { %991 = vmatpush.bf16.msra.mxu1 %v1157_v47 }
 0x5b9   : > { %v1239_v50 = vpop.eup %1238 }
 0x5ba   : > { %v755_v51 = vmul.f32 %v1239_v50, %v1235_v34 }
 0x5bc   : > { %v756_v52 = vpack.c.bf16 %v755_v51, %v755_v51 }
 0x5be   : > { %1102 = vmatmul.msk.bf16.vlgmr.msrb.gmra.mxu3 %vm494_vm5, %v756_v52  ;;  %v1156_v52 = vld [vmem:[%s1617_s10 + $0x10] sm:$0xff] }
 0x5bf   : > { %992 = vmatpush.bf16.msra.mxu1 %v1156_v52 }
 0x5c6   : > { %v602_v55 = vpop.f32.mrf.mxu2 }
 0x5c7   : > { %v606_v56 = vpack.c.bf16 %v602_v55, %v602_v55 }
 0x5c9   : > { %1096 = vmatmul.msk.bf16.vlgmr.msrb.gmra.mxu0 %vm494_vm5, %v606_v56 }
 0x5ce   : > { %v604_v57 = vpop.f32.mrf.mxu2 }
 0x5cf   : > { %v1155_v57 = vld [vmem:[%s1617_s10 + $0x8] sm:$0xff] }
 0x5d0   : > { %993 = vmatpush.bf16.msra.mxu1 %v1155_v57 }
 0x5d6   : > { %v697_v58 = vpop.f32.mrf.mxu2 }
 0x5d7   : > { %v701_v59 = vpack.c.bf16 %v697_v58, %v697_v58 }
 0x5d9   : > { %1100 = vmatmul.msk.bf16.vlgmr.msra.gmra.mxu0 %vm494_vm5, %v701_v59 }
 0x5de   : > { %v699_v60 = vpop.f32.mrf.mxu2 }
 0x641   : > { %v774_v61 = vpop.f32.mrf.mxu3 }
 0x642   : > { %v778_v62 = vpack.c.bf16 %v774_v61, %v774_v61  ;;  %v1154_v61 = vld [vmem:[%s1617_s10] sm:$0xff] }
 0x643   : > { %994 = vmatpush.bf16.msra.mxu1 %v1154_v61 }
 0x644   : > { %1103 = vmatmul.msk.bf16.vlgmr.msrb.gmra.mxu2 %vm494_vm5, %v778_v62 }
 0x646   : > { %v622_v63 = vpop.f32.mrf.mxu0 }
 0x647   : > { %v642_v3 = vadd.f32 %v1488_v14, %v622_v63 }
 0x649   : > { %v776_v1 = vpop.f32.mrf.mxu3 }
 0x64e   : > { %v624_v2 = vpop.f32.mrf.mxu0 }
 0x656   : > { %v717_v4 = vpop.f32.mrf.mxu0 }
 0x657   : > { %v721_v5 = vadd.f32 %v717_v4, %v642_v3 }
 0x65e   : > { %v719_v6 = vpop.f32.mrf.mxu0 }
 0x6c7   : > { %v794_v7 = vpop.f32.mrf.mxu2 }
 0x6c8   : > { %v798_v9 = vadd.f32 %v794_v7, %v721_v5 }
 0x6ca   : > { %v799_v11 = vadd.f32 %v798_v9, %v1438_v0  ;;  %v1153_v0 = vld [vmem:[%s1615_s8 + $0x8] sm:$0xff] }
 0x6cb   : > { %867 = vmatpush.bf16.msrb.mxu0 %v1153_v0 }
 0x6cc   : > { %v1522_v12 = vadd.f32 %v1215_v10, %v799_v11 }
 0x6ce   : > { %v807_v13 = vsel %vm413_vm0, %v1522_v12, 0.0 }
 0x6cf   : > { %v796_v15 = vpop.f32.mrf.mxu2  ;;  %808 = vadd.xlane.f32.xlu2 %v807_v13  ;;  %868 = vmatpush.bf16.msrb.mxu0 %v1152_v20 }
 0x742   : > { %v809_v16 = vpop.xlane.xlu2 %808 }
 0x743   : > { %v810_v14 = vmul.f32 %v809_v16, %v1442_v8 }
 0x745   : > { %v811_v17 = vsub.f32 %v1522_v12, %v810_v14 }
 0x747   : > { %v812_v18 = vmul.f32 %v811_v17, %v811_v17 }
 0x749   : > { %v813_v19 = vsel %vm413_vm0, %v812_v18, 0.0 }
 0x74a   : > { %814 = vadd.xlane.f32.xlu0 %v813_v19 }
 0x7bd   : > { %v815_v21 = vpop.xlane.xlu0 %814 }
 0x7be   : > { %v816_v22 = vmul.f32 %v815_v21, %v1442_v8  ;;  %v1217_v8 = vld [vmem:[%s1614_s7] ss:$0 sm:$0xff] }
 0x7c0   : > { %v817_v23 = vadd.f32 1e-05, %v816_v22 }
 0x7c2   : > { %1240 = vrsqrt.f32 %v817_v23  ;;  %vm824_vm8 = vweird.f32 %v817_v23 }
 0x7c8   : > { %v1241_v24 = vpop.eup %1240 }
 0x7c9   : > { %v819_v25 = vmul.f32 %v1241_v24, %v817_v23  ;;  %vm825_vm7 = vweird.f32 %v1241_v24 }
 0x7ca   : > { %vm826_vm9 = vmor %vm824_vm8, %vm825_vm7 }
 0x7cb   : > { %v820_v26 = vmul.f32 %v1241_v24, %v819_v25 }
 0x7cd   : > { %v821_v27 = vmul.f32 0.5, %v820_v26  ;;  %v1219_v26 = vld [vmem:[%s1618_s11] ss:$0 sm:$0xff] }
 0x7cf   : > { %v822_v28 = vsub.f32 1.5, %v821_v27 }
 0x7d1   : > { %v823_v29 = vmul.f32 %v1241_v24, %v822_v28 }
 0x7d3   : > { %v827_v31 = vsel %vm826_vm9, %v1241_v24, %v823_v29 }
 0x7d4   : > { %v828_v32 = vmul.f32 %v827_v31, %v811_v17 }
 0x7d6   : > { %v832_v34 = vmul.f32 %v1216_v30, %v828_v32 }
 0x7d8   : > { %v836_v35 = vadd.f32 %v1217_v8, %v832_v34 }
 0x7da   : > { %v837_v36 = vpack.c.bf16 %v836_v35, %v836_v35 }
 0x7dc   : > { %1112 = vmatmul.msk.bf16.vlgmr.msrb.gmra.mxu0 %vm413_vm0, %v837_v36 }
 0x859   : > { %v870_v40 = vpop.f32.mrf.mxu0 }
 0x85a   : > { %v871_v41 = vadd.f32 %v1218_v39, %v870_v40 }
 0x85c   : > { %v875_v42 = vmul.f32 0.70710677, %v871_v41  ;;  %v874_v22 = vmul.f32 0.5, %v871_v41 }
 0x85e   : > { %v876_v44 = vmul.f32 %v875_v42, %v875_v42 }
 0x860   : > { %v877_v45 = vmin.f32 %v876_v44, 16.0 }
 0x861   : > { %v872_v46 = vpop.f32.mrf.mxu0 }
 0x862   : > { %v878_v48 = vmul.f32 2.1237322e-06, %v877_v45  ;;  %v889_v49 = vmul.f32 3.8918573e-05, %v877_v45 }
 0x864   : > { %v879_v50 = vadd.f32 0.00028619796, %v878_v48  ;;  %v890_v51 = vadd.f32 0.001143296, %v889_v49 }
 0x866   : > { %v880_v53 = vmul.f32 %v879_v50, %v877_v45  ;;  %v891_v54 = vmul.f32 %v890_v51, %v877_v45 }
 0x868   : > { %v892_v55 = vadd.f32 0.014752088, %v891_v54  ;;  %v881_v56 = vadd.f32 0.0036580483, %v880_v53 }
 0x86a   : > { %v893_v58 = vmul.f32 %v892_v55, %v877_v45  ;;  %v882_v60 = vmul.f32 %v881_v56, %v877_v45 }
 0x86c   : > { %v894_v59 = vadd.f32 0.112945676, %v893_v58  ;;  %v883_v1 = vadd.f32 0.05243302, %v882_v60 }
 0x86e   : > { %v895_v62 = vmul.f32 %v894_v59, %v877_v45  ;;  %v884_v4 = vmul.f32 %v883_v1, %v877_v45 }
 0x870   : > { %v896_v63 = vadd.f32 0.4994258, %v895_v62  ;;  %v885_v5 = vadd.f32 0.18741608, %v884_v4 }
 0x872   : > { %v897_v2 = vmul.f32 %v896_v63, %v877_v45  ;;  %v886_v7 = vmul.f32 %v885_v5, %v877_v45 }
 0x874   : > { %v898_v3 = vadd.f32 1.0, %v897_v2  ;;  %v887_v13 = vadd.f32 1.1283791, %v886_v7 }
 0x876   : > { %1242 = vrcp.f32 %v898_v3  ;;  %v910_v11 = vand.u32 2147483648, %v898_v3  ;;  %v908_v16 = vand.u32 2147483647, %v898_v3  ;;  %vm904_vm11 = vweird.f32 %v898_v3 }
 0x877   : > { %v888_v18 = vmul.f32 %v887_v13, %v875_v42 }
 0x878   : > { %v911_v17 = vor.u32 1.1754944e-38, %v910_v11  ;;  %vm909_vm13 = vcmp.eq.f32.partialorder %v908_v16, 8.507059e+37 }
 0x87c   : > { %v1243_v6 = vpop.eup %1242 }
 0x87d   : > { %v900_v9 = vmul.f32 %v1243_v6, %v898_v3  ;;  %vm905_vm10 = vweird.f32 %v1243_v6 }
 0x87e   : > { %vm906_vm12 = vmor %vm904_vm11, %vm905_vm10 }
 0x87f   : > { %v901_v10 = vsub.f32 1.0, %v900_v9 }
 0x881   : > { %v902_v15 = vmul.f32 %v1243_v6, %v901_v10 }
 0x883   : > { %v903_v14 = vadd.f32 %v1243_v6, %v902_v15 }
 0x885   : > { %v907_v19 = vsel %vm906_vm12, %v1243_v6, %v903_v14 }
 0x886   : > { %v912_v0 = vsel %vm909_vm13, %v911_v17, %v907_v19 }
 0x887   : > { %v913_v20 = vmul.f32 %v912_v0, %v888_v18 }
 0x889   : > { %v1113_v21 = vclamps-f32 %v913_v20, 1.0 }
 0x88b   : > { %v916_v23 = vadd.f32 1.0, %v1113_v21 }
 0x88d   : > { %v917_v24 = vmul.f32 %v916_v23, %v874_v22 }
 0x88f   : > { %v918_v25 = vpack.c.bf16 %v917_v24, %v917_v24 }
 0x891   : > { %995 = vmatmul.bf16.vlgmr.msra.gmra.mxu1 %v918_v25 }
 0x90e   : > { %v996_v27 = vpop.f32.mrf.mxu1 }
 0x90f   : > { %v997_v28 = vadd.f32 %v1219_v26, %v996_v27 }
 0x911   : > { %v1000_v29 = vadd.f32 %v997_v28, %v1522_v12 }
 0x913   : > { %1001 = vst.msk [vmem:[%s404_s20] sm:$0xff] %vm413_vm0, %v1000_v29 }
 0x914   : > { %1271 = shalt.err (!%p1268_p3)
}
 0x915   : > { %1162 = dma.vmem_to_hbm [thread:$0]  (%p1423_p5), %s1016_s0, 128, %s1018_s1, %s1003_s25  }
 0x916   : > { %v998_v12 = vpop.f32.mrf.mxu1 }
 0x917 PF: > { %p1168_p4 = scmp.ge.s32.totalorder %s1306_s24, 2  ;;  %s1029_s26 = sand.u32 1, %s1294_s21  }
 0x918   : > { %s1030_s19 = scalar_lea.sflag [#allocation3], %s1029_s26 }
 0x919   : > { %p1165_p7 = pnand %p1168_p4, %p1427_p6 }
 0x91b   : > { %p1166_p8 = pneg %p1165_p7 }
 0x91d   : > { %1289 = dma.done.wait (%p1166_p8), %s1030_s19, 128  }
 0x91e   : > { %1291 = vsyncadd (%p1166_p8), %s1030_s19, 4294967168  ;;  %p22_p9 = scmp.ge.s32.totalorder %s1410_s27, 4   ;;  %s1628_s21 = smov %s1298_s22 }
 0x91f   : > { %s1629_s22 = smov %s1302_s23  ;;  %s1630_s23 = smov %s1421_s30 }
 0x920   : > { %s1631_s24 = smov %s1410_s27  ;;  %24 = sbr.rel (!%p22_p9) target bundleno = 7 (0x7), region = 103 }
 0x925   :  { %1036 = vsyncpa [#allocation3], 1 }
 0x926   :  { %1038 = vsyncpa [#allocation3 + $0x1], 1 }

</bundles_post_ra>
